<compile_context>
chip_gen: v5e
topology: v5e:2x2
jax: 0.10.0
libtpu: 0.0.40
codegen_flags: <defaults>
</compile_context>

<pallas_src>
import functools

import jax
import jax.numpy as jnp
from jax import lax
from jax.experimental import pallas as pl
from jax.experimental.pallas import tpu as pltpu

LOG_STD_MAX = 2.0
LOG_STD_MIN = -20.0


def _round_up(a, m):
    return ((a + m - 1) // m) * m


def _cdiv(a, b):
    return -(-a // b)


def _actor_kernel(action_dim, x_ref, w1_ref, b1_ref, w2_ref, b2_ref,
                  wh_ref, bh_ref, out_ref):
    """One batch tile of the 3-matmul MLP (mean/log_std heads fused + padded)."""
    # Layer 1: bf16 MXU matmul, f32 accumulate; bias + ReLU in f32.
    h1 = jnp.dot(x_ref[...], w1_ref[...], preferred_element_type=jnp.float32)
    h1 = jnp.maximum(h1 + b1_ref[...], 0.0)

    # Layer 2.
    h2 = jnp.dot(h1.astype(w2_ref.dtype), w2_ref[...],
                 preferred_element_type=jnp.float32)
    h2 = jnp.maximum(h2 + b2_ref[...], 0.0)

    # Fused heads: cols [0, A) = mean, [A, 2A) = log_std, [2A, 128*k) = zero pad.
    heads = jnp.dot(h2.astype(wh_ref.dtype), wh_ref[...],
                    preferred_element_type=jnp.float32) + bh_ref[...]

    # Clamp only the log_std (and pad) columns via a lane mask; pad columns are
    # zero and clamp(0) = 0, and they are sliced off in the wrapper anyway.
    col = lax.broadcasted_iota(jnp.int32, heads.shape, 1)
    clamped = jnp.clip(heads, LOG_STD_MIN, LOG_STD_MAX)
    out_ref[...] = jnp.where(col < action_dim, heads, clamped).astype(out_ref.dtype)


def prepare_actor_params(params):
    """One-time weight prep: fuse heads, pad hidden/output dims to 128 lanes,
    cast matmul operands to bf16.  Call once and reuse across forward calls."""
    state_dim, hid1 = params["w1"].shape
    hid2 = params["w2"].shape[1]
    action_dim = params["wm"].shape[1]

    hid1_p = _round_up(hid1, 128)
    hid2_p = _round_up(hid2, 128)
    out_w = _round_up(2 * action_dim, 128)

    w1 = jnp.pad(params["w1"], ((0, 0), (0, hid1_p - hid1)))
    b1 = jnp.pad(params["b1"], ((0, 0), (0, hid1_p - hid1)))
    w2 = jnp.pad(params["w2"], ((0, hid1_p - hid1), (0, hid2_p - hid2)))
    b2 = jnp.pad(params["b2"], ((0, 0), (0, hid2_p - hid2)))

    wh = jnp.concatenate([params["wm"], params["ws"]], axis=1)
    bh = jnp.concatenate([params["bm"], params["bs"]], axis=1)
    wh = jnp.pad(wh, ((0, hid2_p - hid2), (0, out_w - 2 * action_dim)))
    bh = jnp.pad(bh, ((0, 0), (0, out_w - 2 * action_dim)))

    return {
        # bf16 matmul operands (MXU throughput / HBM bytes); biases stay f32.
        "w1": w1.astype(jnp.bfloat16), "b1": b1,
        "w2": w2.astype(jnp.bfloat16), "b2": b2,
        "wh": wh.astype(jnp.bfloat16), "bh": bh,
        "action_dim": action_dim,
        "state_dim": state_dim,
        "out_w": out_w,
    }


def actor_forward(x, prep, *, tm=1024):
    """Run the Actor MLP forward pass as a single batch-tiled Pallas TPU kernel.

    Args:
      x: [batch, state_dim] float32 state.
      prep: output of prepare_actor_params(params).
      tm: max rows per grid step (batch tile). Capped at 4096 (v7x 64 MiB VMEM).

    Returns:
      (mean, log_std): each [batch, action_dim] float32.
    """
    batch, state_dim = x.shape
    assert state_dim == prep["state_dim"]
    action_dim = prep["action_dim"]
    out_w = prep["out_w"]

    x_bf = x.astype(jnp.bfloat16)

    # Choose the number of grid steps first, then size the tile to it so batch
    # padding stays small; round tiles to 16 rows (bf16 sublane packing).
    tm_cap = min(tm, 4096)
    n_steps = max(1, _cdiv(batch, tm_cap))
    tm_eff = _round_up(_cdiv(batch, n_steps), 16)
    batch_p = n_steps * tm_eff
    if batch_p != batch:
        x_bf = jnp.pad(x_bf, ((0, batch_p - batch), (0, 0)))

    # Weights/biases: constant index maps -> VMEM-resident, DMA'd once.
    full = lambda a: pl.BlockSpec(a.shape, lambda i: (0, 0))

    out = pl.pallas_call(
        functools.partial(_actor_kernel, action_dim),
        out_shape=jax.ShapeDtypeStruct((batch_p, out_w), jnp.float32),
        grid=(n_steps,),
        in_specs=[
            pl.BlockSpec((tm_eff, state_dim), lambda i: (i, 0)),  # x tile
            full(prep["w1"]), full(prep["b1"]),
            full(prep["w2"]), full(prep["b2"]),
            full(prep["wh"]), full(prep["bh"]),
        ],
        out_specs=pl.BlockSpec((tm_eff, out_w), lambda i: (i, 0)),
        compiler_params=pltpu.CompilerParams(
            dimension_semantics=("parallel",)),
    )(x_bf, prep["w1"], prep["b1"], prep["w2"], prep["b2"],
      prep["wh"], prep["bh"])

    mean = out[:batch, :action_dim]
    log_std = out[:batch, action_dim:2 * action_dim]   # NOT [:, A:] (pad cols)
    return mean, log_std


def init_actor_params(key, state_dim, action_dim, hidden_dims):
    """Deterministic synthetic init (PyTorch-Linear-style uniform fan-in bounds)."""
    def linear(k, fan_in, fan_out):
        kw, kb = jax.random.split(k)
        bound = 1.0 / jnp.sqrt(fan_in)
        # stored transposed: [in, out]
        w = jax.random.uniform(kw, (fan_in, fan_out), jnp.float32, -bound, bound)
        b = jax.random.uniform(kb, (1, fan_out), jnp.float32, -bound, bound)
        return w, b

    k1, k2, k3, k4 = jax.random.split(key, 4)
    w1, b1 = linear(k1, state_dim, hidden_dims[0])
    w2, b2 = linear(k2, hidden_dims[0], hidden_dims[1])
    wm, bm = linear(k3, hidden_dims[1], action_dim)
    ws, bs = linear(k4, hidden_dims[1], action_dim)
    return {"w1": w1, "b1": b1, "w2": w2, "b2": b2,
            "wm": wm, "bm": bm, "ws": ws, "bs": bs}


def actor_forward_ref(x, p):
    """Pure-JAX f32 reference of the same math (PyTorch forward semantics)."""
    h1 = jnp.maximum(x @ p["w1"] + p["b1"], 0.0)
    h2 = jnp.maximum(h1 @ p["w2"] + p["b2"], 0.0)
    mean = h2 @ p["wm"] + p["bm"]
    log_std = jnp.clip(h2 @ p["ws"] + p["bs"], LOG_STD_MIN, LOG_STD_MAX)
    return mean, log_std


if __name__ == "__main__":
    # Small, forward-consistent shapes.
    batch, state_dim, action_dim = 8, 16, 8
    hidden_dims = [32, 32]

    key = jax.random.PRNGKey(0)
    kx, kp = jax.random.split(key)
    x = jax.random.normal(kx, (batch, state_dim), jnp.float32)
    params = init_actor_params(kp, state_dim, action_dim, hidden_dims)

    # One-time weight prep (fuse heads, pad to lane-dense widths, cast to bf16).
    prep = prepare_actor_params(params)

    mean, log_std = actor_forward(x, prep)
    jax.block_until_ready((mean, log_std))

    # Verify against pure-JAX f32 reference. Tolerance accounts for bf16
    # matmul operands (f32 accumulation).
    mean_ref, log_std_ref = actor_forward_ref(x, params)
    assert mean.shape == (batch, action_dim)
    assert log_std.shape == (batch, action_dim)
    assert jnp.allclose(mean, mean_ref, atol=2e-2, rtol=2e-2), (
        float(jnp.max(jnp.abs(mean - mean_ref))))
    assert jnp.allclose(log_std, log_std_ref, atol=2e-2, rtol=2e-2), (
        float(jnp.max(jnp.abs(log_std - log_std_ref))))
    assert bool(jnp.all(log_std <= LOG_STD_MAX)) and bool(jnp.all(log_std >= LOG_STD_MIN))

    # TODO(synk): `Actor.sample` (rsample + tanh-squash log-prob) is RNG-driven
    # policy sampling; it stays in plain JAX and is not part of the forward kernel.

    print("KERNEL_OK")
</pallas_src>

<mosaic_0001>
module attributes {stable_mosaic.version = 11 : i64} {
  func.func @_actor_kernel(%arg0: i32, %arg1: memref<16x16xbf16, #tpu.memory_space<vmem>>, %arg2: memref<16x128xbf16, #tpu.memory_space<vmem>>, %arg3: memref<1x128xf32, #tpu.memory_space<vmem>>, %arg4: memref<128x128xbf16, #tpu.memory_space<vmem>>, %arg5: memref<1x128xf32, #tpu.memory_space<vmem>>, %arg6: memref<128x128xbf16, #tpu.memory_space<vmem>>, %arg7: memref<1x128xf32, #tpu.memory_space<vmem>>, %arg8: memref<16x128xf32, #tpu.memory_space<vmem>>) attributes {dimension_semantics = [#tpu.dimension_semantics<parallel>], iteration_bounds = array<i64: 1>, scalar_prefetch = 0 : i64, scratch_operands = 0 : i64, tpu.core_type = #tpu.core_type<tc>, window_params = [{transform_indices = @transform_0, window_bounds = array<i64: 16, 16>}, {pipeline_mode = #tpu.pipeline_mode<synchronous>, transform_indices = @transform_1, window_bounds = array<i64: 16, 128>}, {pipeline_mode = #tpu.pipeline_mode<synchronous>, transform_indices = @transform_2, window_bounds = array<i64: 1, 128>}, {pipeline_mode = #tpu.pipeline_mode<synchronous>, transform_indices = @transform_3, window_bounds = array<i64: 128, 128>}, {pipeline_mode = #tpu.pipeline_mode<synchronous>, transform_indices = @transform_4, window_bounds = array<i64: 1, 128>}, {pipeline_mode = #tpu.pipeline_mode<synchronous>, transform_indices = @transform_5, window_bounds = array<i64: 128, 128>}, {pipeline_mode = #tpu.pipeline_mode<synchronous>, transform_indices = @transform_6, window_bounds = array<i64: 1, 128>}, {transform_indices = @transform_7, window_bounds = array<i64: 16, 128>}]} {
    %c0 = arith.constant 0 : index
    %c0_0 = arith.constant 0 : index
    %0 = vector.load %arg1[%c0, %c0_0] : memref<16x16xbf16, #tpu.memory_space<vmem>>, vector<16x16xbf16>
    %c0_1 = arith.constant 0 : index
    %c0_2 = arith.constant 0 : index
    %1 = vector.load %arg2[%c0_1, %c0_2] : memref<16x128xbf16, #tpu.memory_space<vmem>>, vector<16x128xbf16>
    %cst = arith.constant dense<0.000000e+00> : vector<16x128xf32>
    %2 = tpu.matmul %0, %1, %cst {dimension_numbers = #tpu.dot_dimension_numbers<[1], [0], [0], [1], [0, 0, 1, 1], [], []>} : vector<16x16xbf16>, vector<16x128xbf16>, vector<16x128xf32> -> vector<16x128xf32>
    %c0_3 = arith.constant 0 : index
    %c0_4 = arith.constant 0 : index
    %3 = vector.load %arg3[%c0_3, %c0_4] : memref<1x128xf32, #tpu.memory_space<vmem>>, vector<1x128xf32>
    %4 = vector.broadcast %3 : vector<1x128xf32> to vector<16x128xf32>
    %5 = arith.addf %2, %4 : vector<16x128xf32>
    %cst_5 = arith.constant 0.000000e+00 : f32
    %6 = vector.broadcast %cst_5 : f32 to vector<16x128xf32>
    %7 = arith.maximumf %5, %6 : vector<16x128xf32>
    %8 = arith.truncf %7 : vector<16x128xf32> to vector<16x128xbf16>
    %c0_6 = arith.constant 0 : index
    %c0_7 = arith.constant 0 : index
    %9 = vector.load %arg4[%c0_6, %c0_7] : memref<128x128xbf16, #tpu.memory_space<vmem>>, vector<128x128xbf16>
    %cst_8 = arith.constant dense<0.000000e+00> : vector<16x128xf32>
    %10 = tpu.matmul %8, %9, %cst_8 {dimension_numbers = #tpu.dot_dimension_numbers<[1], [0], [0], [1], [0, 0, 1, 1], [], []>} : vector<16x128xbf16>, vector<128x128xbf16>, vector<16x128xf32> -> vector<16x128xf32>
    %c0_9 = arith.constant 0 : index
    %c0_10 = arith.constant 0 : index
    %11 = vector.load %arg5[%c0_9, %c0_10] : memref<1x128xf32, #tpu.memory_space<vmem>>, vector<1x128xf32>
    %12 = vector.broadcast %11 : vector<1x128xf32> to vector<16x128xf32>
    %13 = arith.addf %10, %12 : vector<16x128xf32>
    %cst_11 = arith.constant 0.000000e+00 : f32
    %14 = vector.broadcast %cst_11 : f32 to vector<16x128xf32>
    %15 = arith.maximumf %13, %14 : vector<16x128xf32>
    %16 = arith.truncf %15 : vector<16x128xf32> to vector<16x128xbf16>
    %c0_12 = arith.constant 0 : index
    %c0_13 = arith.constant 0 : index
    %17 = vector.load %arg6[%c0_12, %c0_13] : memref<128x128xbf16, #tpu.memory_space<vmem>>, vector<128x128xbf16>
    %cst_14 = arith.constant dense<0.000000e+00> : vector<16x128xf32>
    %18 = tpu.matmul %16, %17, %cst_14 {dimension_numbers = #tpu.dot_dimension_numbers<[1], [0], [0], [1], [0, 0, 1, 1], [], []>} : vector<16x128xbf16>, vector<128x128xbf16>, vector<16x128xf32> -> vector<16x128xf32>
    %c0_15 = arith.constant 0 : index
    %c0_16 = arith.constant 0 : index
    %19 = vector.load %arg7[%c0_15, %c0_16] : memref<1x128xf32, #tpu.memory_space<vmem>>, vector<1x128xf32>
    %20 = vector.broadcast %19 : vector<1x128xf32> to vector<16x128xf32>
    %21 = arith.addf %18, %20 : vector<16x128xf32>
    %22 = tpu.iota {dimensions = array<i32: 1>} : vector<16x128xi32>
    %cst_17 = arith.constant -2.000000e+01 : f32
    %cst_18 = arith.constant 2.000000e+00 : f32
    %23 = vector.broadcast %cst_17 : f32 to vector<16x128xf32>
    %24 = arith.maximumf %23, %21 : vector<16x128xf32>
    %25 = vector.broadcast %cst_18 : f32 to vector<16x128xf32>
    %26 = arith.minimumf %25, %24 : vector<16x128xf32>
    %c8_i32 = arith.constant 8 : i32
    %27 = vector.broadcast %c8_i32 : i32 to vector<16x128xi32>
    %28 = arith.cmpi slt, %22, %27 : vector<16x128xi32>
    %29 = arith.select %28, %21, %26 : vector<16x128xi1>, vector<16x128xf32>
    %c0_19 = arith.constant 0 : index
    %c0_20 = arith.constant 0 : index
    %30 = vector.load %arg8[%c0_19, %c0_20] : memref<16x128xf32, #tpu.memory_space<vmem>>, vector<16x128xf32>
    tpu.vector_store %arg8[%c0_19, %c0_20], %29 {strides = array<i32>} : memref<16x128xf32, #tpu.memory_space<vmem>>, vector<16x128xf32>,
    return
  }
  func.func @transform_0(%arg0: i32) -> (i32, i32) {
    %c0_i32 = arith.constant 0 : i32
    %c0_i32_0 = arith.constant 0 : i32
    return %arg0, %c0_i32 : i32, i32
  }
  func.func @transform_1(%arg0: i32) -> (i32, i32) {
    %c0_i32 = arith.constant 0 : i32
    %c0_i32_0 = arith.constant 0 : i32
    %c0_i32_1 = arith.constant 0 : i32
    return %c0_i32, %c0_i32_0 : i32, i32
  }
  func.func @transform_2(%arg0: i32) -> (i32, i32) {
    %c0_i32 = arith.constant 0 : i32
    %c0_i32_0 = arith.constant 0 : i32
    %c0_i32_1 = arith.constant 0 : i32
    return %c0_i32, %c0_i32_0 : i32, i32
  }
  func.func @transform_3(%arg0: i32) -> (i32, i32) {
    %c0_i32 = arith.constant 0 : i32
    %c0_i32_0 = arith.constant 0 : i32
    %c0_i32_1 = arith.constant 0 : i32
    return %c0_i32, %c0_i32_0 : i32, i32
  }
  func.func @transform_4(%arg0: i32) -> (i32, i32) {
    %c0_i32 = arith.constant 0 : i32
    %c0_i32_0 = arith.constant 0 : i32
    %c0_i32_1 = arith.constant 0 : i32
    return %c0_i32, %c0_i32_0 : i32, i32
  }
  func.func @transform_5(%arg0: i32) -> (i32, i32) {
    %c0_i32 = arith.constant 0 : i32
    %c0_i32_0 = arith.constant 0 : i32
    %c0_i32_1 = arith.constant 0 : i32
    return %c0_i32, %c0_i32_0 : i32, i32
  }
  func.func @transform_6(%arg0: i32) -> (i32, i32) {
    %c0_i32 = arith.constant 0 : i32
    %c0_i32_0 = arith.constant 0 : i32
    %c0_i32_1 = arith.constant 0 : i32
    return %c0_i32, %c0_i32_0 : i32, i32
  }
  func.func @transform_7(%arg0: i32) -> (i32, i32) {
    %c0_i32 = arith.constant 0 : i32
    %c0_i32_0 = arith.constant 0 : i32
    return %arg0, %c0_i32 : i32, i32
  }
}

</mosaic_0001>

<bundles_post_ra>
// kernel: tpu_custom_call.1
= control target key start
LH: loop header
LB: loop body
LE: loop exit
PB: predicated region body
PF: predicated region fallthrough
CT: control target
= control target key end

     0   :  { %12 = vsyncpa [#allocation3], 0  ;;  %s634_s0 = inlined_call_operand.hbm [shape: bf16[16,16], index: 0, kind: input, shape index: {}]   ;;  %s635_s1 = inlined_call_operand.hbm [shape: bf16[16,128], index: 1, kind: input, shape index: {}]   ;;  %s636_s2 = inlined_call_operand.vmem [shape: f32[1,128], index: 2, kind: input, shape index: {}]   ;;  %s637_s3 = inlined_call_operand.hbm [shape: bf16[128,128], index: 3, kind: input, shape index: {}]   ;;  %s638_s4 = inlined_call_operand.vmem [shape: f32[1,128], index: 4, kind: input, shape index: {}]   ;;  %s639_s5 = inlined_call_operand.hbm [shape: bf16[128,128], index: 5, kind: input, shape index: {}]   ;;  %s640_s6 = inlined_call_operand.vmem [shape: f32[1,128], index: 6, kind: input, shape index: {}]   ;;  %s641_s7 = inlined_call_operand.hbm [shape: f32[16,128], index: 7, kind: output, shape index: {}]  }
   0x1   :  { %13 = vsyncpa [#allocation6], 0 }
   0x2   :  { %14 = vsyncpa [#allocation9], 0 }
   0x3   :  { %15 = vsyncpa [#allocation4], 0  ;;  %s33_s26 = sshll.u32 %s635_s1, 4  ;;  %s561_s27 = smov [#allocation5]   ;;  %s34_s26 = int_to_ptr.hbm [resolvable:$true] %s33_s26 }
   0x4   :  { %s35_s28 = sshll.u32 %s561_s27, 4  ;;  %s20_s8 = sshll.u32 %s634_s0, 4  ;;  %s36_s28 = int_to_ptr.vmem [resolvable:$true] %s35_s28  ;;  %s21_s8 = int_to_ptr.hbm [resolvable:$true] %s20_s8 }
   0x5   :  { %s562_s9 = smov 64   ;;  %s563_s10 = smov 4  }
   0x6   :  { %41 = dma.hbm_to_vmem [thread:$0]  %s34_s26, 128, %s36_s28, [#allocation6], %s562_s9, %s562_s9, %s563_s10  }
   0x7   :  { %s564_s11 = smov [#allocation2]   ;;  %s48_s15 = sshll.u32 %s637_s3, 4  ;;  %s49_s15 = int_to_ptr.hbm [resolvable:$true] %s48_s15 }
   0x8   :  { %s22_s12 = sshll.u32 %s564_s11, 4  ;;  %s63_s17 = sshll.u32 %s639_s5, 4  ;;  %s23_s12 = int_to_ptr.vmem [resolvable:$true] %s22_s12  ;;  %s64_s17 = int_to_ptr.hbm [resolvable:$true] %s63_s17 }
   0x9   :  { %28 = dma.hbm_to_vmem [thread:$0]  %s21_s8, 128, %s23_s12, [#allocation3], %s562_s9, %s562_s9, %s563_s10  }
   0xa   :  { %s565_s18 = smov [#allocation7]   ;;  %s566_s0 = smov [#allocation8]  }
   0xb   :  { %s50_s19 = sshll.u32 %s565_s18, 4  ;;  %s65_s20 = sshll.u32 %s566_s0, 4  ;;  %s51_s19 = int_to_ptr.vmem [resolvable:$true] %s50_s19  ;;  %s66_s20 = int_to_ptr.vmem [resolvable:$true] %s65_s20 }
   0xc   :  { %56 = dma.hbm_to_vmem [thread:$0]  %s49_s15, 1024, %s51_s19, [#allocation6], %s562_s9, %s562_s9, %s563_s10  }
   0xd   :  { %71 = dma.hbm_to_vmem [thread:$0]  %s64_s17, 1024, %s66_s20, [#allocation9], %s562_s9, %s562_s9, %s563_s10  }
   0xe   :  { %553 = dma.done.wait [#allocation3], 128  }
   0xf   :  { %554 = vsyncadd [#allocation3], 4294967168 }
  0x10   :  { %555 = dma.done.wait [#allocation6], 1152  }
  0x11   :  { %556 = vsyncadd [#allocation6], 4294966144 }
  0x12   :  { %557 = dma.done.wait [#allocation9], 1024  }
  0x13   :  { %558 = vsyncadd [#allocation9], 4294966272  ;;  %v404_v0 = vld [vmem:[#allocation5] sm:$0xff]  ;;  %v403_v2 = vld [vmem:[#allocation2] sm:$0xff]  ;;  %vm110_vm0 = vcmask 130048   ;;  %v298_v34 = vlaneseq  ;;  %s315_s27 = sshll.u32 %s641_s7, 4  ;;  %s316_s27 = int_to_ptr.hbm [resolvable:$true] %s315_s27 }
  0x14   :  { %v412_v1 = vld [vmem:[#allocation7 + $0x38] sm:$0xff]  ;;  %121 = vmatpush.bf16.msra.mxu0 %v404_v0  ;;  %v411_v3 = vld [vmem:[#allocation7 + $0x30] sm:$0xff]  ;;  %v410_v4 = vld [vmem:[#allocation7 + $0x28] sm:$0xff]  ;;  %s569_s28 = smov 8  }
  0x15   :  { %199 = vmatpush.bf16.msra.mxu1 %v412_v1  ;;  %v409_v5 = vld [vmem:[#allocation7 + $0x20] sm:$0xff]  ;;  %v408_v6 = vld [vmem:[#allocation7 + $0x18] sm:$0xff]  ;;  %v407_v7 = vld [vmem:[#allocation7 + $0x10] sm:$0xff]  ;;  %v299_v37 = vand.u32 127, %v298_v34 }
  0x16   :  { %v406_v8 = vld [vmem:[#allocation7 + $0x8] sm:$0xff]  ;;  %v405_v9 = vld [vmem:[#allocation7] sm:$0xff]  ;;  %v420_v10 = vld [vmem:[#allocation8 + $0x38] sm:$0xff] }
  0x17   :  { %338 = vmatmul.msk.bf16.vlgmr.msra.gmra.mxu0 %vm110_vm0, %v403_v2  ;;  %284 = vmatpush.bf16.msra.mxu2 %v420_v10  ;;  %v419_v11 = vld [vmem:[#allocation8 + $0x30] sm:$0xff]  ;;  %v418_v12 = vld [vmem:[#allocation8 + $0x28] sm:$0xff]  ;;  %v417_v13 = vld [vmem:[#allocation8 + $0x20] sm:$0xff]  ;;  %vm304_vm1 = vcmp.lt.s32.totalorder %v299_v37, 8 }
  0x18   :  { %v430_v15 = vld [vmem:[%s636_s2] ss:$0 sm:$0xff]  ;;  %v416_v22 = vld [vmem:[#allocation8 + $0x18] sm:$0xff]  ;;  %v414_v24 = vld [vmem:[#allocation8 + $0x8] sm:$0xff] }
  0x19   :  { %200 = vmatpush.bf16.msra.mxu1 %v411_v3  ;;  %v415_v23 = vld [vmem:[#allocation8 + $0x10] sm:$0xff]  ;;  %v413_v25 = vld [vmem:[#allocation8] sm:$0xff] }
  0x1a   :  { %v431_v27 = vld [vmem:[%s638_s4] ss:$0 sm:$0xff]  ;;  %s567_s4 = smov [#allocation10]  }
  0x1b   :  { %285 = vmatpush.bf16.msra.mxu2 %v419_v11  ;;  %v432_v35 = vld [vmem:[%s640_s6] ss:$0 sm:$0xff]  ;;  %s313_s24 = sshll.u32 %s567_s4, 4  ;;  %s568_s6 = smov 128   ;;  %s314_s24 = int_to_ptr.vmem [resolvable:$true] %s313_s24 }
  0x1d   :  { %201 = vmatpush.bf16.msra.mxu1 %v410_v4 }
  0x1f   :  { %286 = vmatpush.bf16.msra.mxu2 %v418_v12 }
  0x21   :  { %202 = vmatpush.bf16.msra.mxu1 %v409_v5 }
  0x23   :  { %287 = vmatpush.bf16.msra.mxu2 %v417_v13 }
  0x25   :  { %203 = vmatpush.bf16.msra.mxu1 %v408_v6 }
  0x27   :  { %288 = vmatpush.bf16.msra.mxu2 %v416_v22 }
  0x29   :  { %204 = vmatpush.bf16.msra.mxu1 %v407_v7 }
  0x2b   :  { %289 = vmatpush.bf16.msra.mxu2 %v415_v23 }
  0x2d   :  { %205 = vmatpush.bf16.msra.mxu1 %v406_v8 }
  0x2f   :  { %290 = vmatpush.bf16.msra.mxu2 %v414_v24 }
  0x31   :  { %206 = vmatpush.bf16.msra.mxu1 %v405_v9 }
  0x33   :  { %291 = vmatpush.bf16.msra.mxu2 %v413_v25 }
  0x94   :  { %v123_v14 = vpop.f32.mrf.mxu0 }
  0x95   :  { %v124_v16 = vadd.f32 %v430_v15, %v123_v14 }
  0x97   :  { %v128_v19 = vmax.f32 %v124_v16, 0.0 }
  0x9c   :  { %v125_v17 = vpop.f32.mrf.mxu0 }
  0x9d   :  { %v126_v18 = vadd.f32 %v430_v15, %v125_v17 }
  0x9f   :  { %v129_v20 = vmax.f32 %v126_v18, 0.0 }
  0xa1   :  { %v130_v21 = vpack.c.bf16 %v129_v20, %v128_v19 }
  0xa3   :  { %207 = vmatmul.bf16.vlgmr.msra.gmra.mxu1 %v130_v21 }
 0x120   :  { %v208_v26 = vpop.f32.mrf.mxu1 }
 0x121   :  { %v209_v28 = vadd.f32 %v431_v27, %v208_v26 }
 0x123   :  { %v213_v31 = vmax.f32 %v209_v28, 0.0 }
 0x128   :  { %v210_v29 = vpop.f32.mrf.mxu1 }
 0x129   :  { %v211_v30 = vadd.f32 %v431_v27, %v210_v29 }
 0x12b   :  { %v214_v32 = vmax.f32 %v211_v30, 0.0 }
 0x12d   :  { %v215_v33 = vpack.c.bf16 %v214_v32, %v213_v31 }
 0x12f   :  { %292 = vmatmul.bf16.vlgmr.msra.gmra.mxu2 %v215_v33 }
 0x1b2   :  { %v293_v36 = vpop.f32.mrf.mxu2 }
 0x1b3   :  { %v294_v38 = vadd.f32 %v432_v35, %v293_v36 }
 0x1b5   :  { %v300_v39 = vmax.f32 %v294_v38, -20.0 }
 0x1b7   :  { %v302_v40 = vmin.f32 %v300_v39, 2.0 }
 0x1b9   :  { %v305_v41 = vsel %vm304_vm1, %v294_v38, %v302_v40 }
 0x1ba   :  { %307 = vst [vmem:[#allocation10] sm:$0xff] %v305_v41  ;;  %v295_v42 = vpop.f32.mrf.mxu2 }
 0x1bb   :  { %v296_v43 = vadd.f32 %v432_v35, %v295_v42 }
 0x1bd   :  { %v301_v44 = vmax.f32 %v296_v43, -20.0 }
 0x1bf   :  { %v303_v45 = vmin.f32 %v301_v44, 2.0 }
 0x1c1   :  { %v306_v46 = vsel %vm304_vm1, %v296_v43, %v303_v45 }
 0x1c2   :  { %308 = vst [vmem:[#allocation10 + $0x8] sm:$0xff] %v306_v46 }
 0x1c3   :  { %321 = dma.vmem_to_hbm [thread:$0]  %s314_s24, 256, %s316_s27, [#allocation4], %s568_s6, %s568_s6, %s569_s28  }
 0x1c4   :  { %559 = dma.done.wait [#allocation4], 256  }
 0x1c5   :  { %560 = vsyncadd [#allocation4], 4294967040 }
 0x1c6   :  { %326 = vsyncpa [#allocation3], 1 }
 0x1c7   :  { %327 = vsyncpa [#allocation6], 1 }
 0x1c8   :  { %328 = vsyncpa [#allocation9], 1 }
 0x1c9   :  { %329 = vsyncpa [#allocation4], 1 }

</bundles_post_ra>
